<compile_context>
chip_gen: v5e
topology: v5e:2x2
jax: 0.10.0
libtpu: 0.0.40
codegen_flags: <defaults>
</compile_context>

<pallas_src>
import functools

import jax
import jax.numpy as jnp
from jax import lax
from jax.experimental import pallas as pl
from jax.experimental.pallas import tpu as pltpu


def _round_up(x, m):
    return ((x + m - 1) // m) * m


def _actor_kernel(x_ref, w1_ref, b1_ref, w2_ref, b2_ref, wh_ref, bh_ref,
                  out_ref, *, action_dim):
    """One batch tile: shared MLP + fused (mu|sigma) head, all in VMEM."""
    x = x_ref[...]

    # shared_net: Linear -> ReLU -> Linear -> ReLU (MXU matmuls, f32 accum,
    # bias/ReLU in f32).
    h1 = jnp.dot(x, w1_ref[...], preferred_element_type=jnp.float32) + b1_ref[...]
    h1 = jnp.maximum(h1, 0.0)
    h2 = jnp.dot(h1.astype(w2_ref.dtype), w2_ref[...],
                 preferred_element_type=jnp.float32) + b2_ref[...]
    h2 = jnp.maximum(h2, 0.0)

    # Fused head: one matmul yields [mu_lin | sigma_lin | zero-pad] lanes.
    lin = jnp.dot(h2.astype(wh_ref.dtype), wh_ref[...],
                  preferred_element_type=jnp.float32) + bh_ref[...]

    # Single-pass numerically-stable softplus + 1e-4 (sigma head).
    sp = jnp.maximum(lin, 0.0) + jnp.log1p(jnp.exp(-jnp.abs(lin))) + 1e-4
    # mu head = tanh; select per output lane (cols < A are mu, [A, 2A) sigma,
    # the rest is padding that the wrapper slices off).
    col = lax.broadcasted_iota(jnp.int32, lin.shape, 1)
    out_ref[...] = jnp.where(col < action_dim, jnp.tanh(lin), sp)


def _pack_params(params, matmul_dtype):
    """Pad hidden to a lane-aligned 128 (exact, zeros) and fuse the mu|sigma
    head weights/biases into one lane-dense (H, HP) matrix."""
    F, hid = params["w1"].shape
    A = params["wmu"].shape[1]
    H = max(128, _round_up(hid, 128))
    HP = max(128, _round_up(2 * A, 128))
    f32 = jnp.float32

    w1 = jnp.zeros((F, H), f32).at[:, :hid].set(params["w1"])
    b1 = jnp.zeros((1, H), f32).at[:, :hid].set(params["b1"])
    w2 = jnp.zeros((H, H), f32).at[:hid, :hid].set(params["w2"])
    b2 = jnp.zeros((1, H), f32).at[:, :hid].set(params["b2"])
    wh = (jnp.zeros((H, HP), f32)
          .at[:hid, :A].set(params["wmu"])
          .at[:hid, A:2 * A].set(params["wsig"]))
    bh = (jnp.zeros((1, HP), f32)
          .at[:, :A].set(params["bmu"])
          .at[:, A:2 * A].set(params["bsig"]))

    weights = (w1.astype(matmul_dtype), b1, w2.astype(matmul_dtype), b2,
               wh.astype(matmul_dtype), bh)
    return weights, A, H, HP


def actor_network_forward(x, params, *, batch_tile=2048,
                          matmul_dtype=jnp.float32):
    """x: (B, feature_dim) f32. Returns (mu, sigma), each (B, action_dim) f32.

    matmul_dtype=jnp.bfloat16 casts matmul operands only (f32 accumulation and
    f32 epilogue) for higher MXU throughput on v6e/v7x.
    """
    B, F = x.shape
    (w1, b1, w2, b2, wh, bh), A, H, HP = _pack_params(params, matmul_dtype)

    # Batch tile: multiple of 8 sublanes, capped for VMEM; pad B up to a
    # whole number of tiles (padded rows are garbage and sliced off).
    TB = min(batch_tile, _round_up(B, 8))
    B_pad = _round_up(B, TB)
    x_p = x if B_pad == B else jnp.pad(x, ((0, B_pad - B), (0, 0)))
    x_p = x_p.astype(matmul_dtype)

    grid = (B_pad // TB,)
    mm_bytes = jnp.dtype(matmul_dtype).itemsize
    cost = pl.CostEstimate(
        flops=2 * B_pad * (F * H + H * H + H * HP),
        transcendentals=3 * B_pad * HP,
        bytes_accessed=(B_pad * F * mm_bytes            # streamed x
                        + B_pad * HP * 4                # packed output
                        + (F * H + H * H + H * HP) * mm_bytes
                        + (2 * H + HP) * 4),            # biases
    )

    resident = lambda i: (0, 0)  # weights/biases: same block every grid step
    out = pl.pallas_call(
        functools.partial(_actor_kernel, action_dim=A),
        out_shape=jax.ShapeDtypeStruct((B_pad, HP), jnp.float32),
        grid_spec=pltpu.PrefetchScalarGridSpec(
            num_scalar_prefetch=0,
            grid=grid,
            in_specs=[
                pl.BlockSpec((TB, F), lambda i: (i, 0)),   # x tile (pipelined)
                pl.BlockSpec((F, H), resident),            # w1
                pl.BlockSpec((1, H), resident),            # b1
                pl.BlockSpec((H, H), resident),            # w2
                pl.BlockSpec((1, H), resident),            # b2
                pl.BlockSpec((H, HP), resident),           # fused head weight
                pl.BlockSpec((1, HP), resident),           # fused head bias
            ],
            out_specs=pl.BlockSpec((TB, HP), lambda i: (i, 0)),
        ),
        compiler_params=pltpu.CompilerParams(
            dimension_semantics=("parallel",),   # dual-TC sharding on v7x
            vmem_limit_bytes=32 * 1024 * 1024,   # explicit, safe on v5e..v7x
        ),
        cost_estimate=cost,
    )(x_p, w1, b1, w2, b2, wh, bh)

    mu = out[:B, :A]
    sigma = out[:B, A:2 * A]
    return mu, sigma


def init_params(key, feature_dim, action_dim, hidden=64):
    """Deterministic init mirroring PyTorch's shapes/ranges (not a checkpoint)."""
    ks = jax.random.split(key, 8)

    def unif(k, shape, bound):
        return jax.random.uniform(k, shape, jnp.float32, -bound, bound)

    b_in = 1.0 / jnp.sqrt(feature_dim)
    b_h = 1.0 / jnp.sqrt(hidden)
    return {
        "w1": unif(ks[0], (feature_dim, hidden), b_in),
        "b1": unif(ks[1], (1, hidden), b_in),
        "w2": unif(ks[2], (hidden, hidden), b_h),
        "b2": unif(ks[3], (1, hidden), b_h),
        # mu / sigma weights: nn.init.uniform_(-0.001, 0.001); biases default
        "wmu": unif(ks[4], (hidden, action_dim), 0.001),
        "bmu": unif(ks[5], (1, action_dim), b_h),
        "wsig": unif(ks[6], (hidden, action_dim), 0.001),
        "bsig": unif(ks[7], (1, action_dim), b_h),
    }


def _reference_forward(x, p):
    h1 = jnp.maximum(x @ p["w1"] + p["b1"], 0.0)
    h2 = jnp.maximum(h1 @ p["w2"] + p["b2"], 0.0)
    mu = jnp.tanh(h2 @ p["wmu"] + p["bmu"])
    sigma = jax.nn.softplus(h2 @ p["wsig"] + p["bsig"]) + 1e-4
    return mu, sigma


if __name__ == "__main__":
    key = jax.random.PRNGKey(0)
    feature_dim, action_dim, batch = 8, 4, 2

    kx, kp = jax.random.split(key)
    x = jax.random.normal(kx, (batch, feature_dim), dtype=jnp.float32)
    params = init_params(kp, feature_dim, action_dim)

    mu, sigma = jax.block_until_ready(actor_network_forward(x, params))

    mu_ref, sigma_ref = _reference_forward(x, params)
    assert mu.shape == (batch, action_dim) and sigma.shape == (batch, action_dim)
    assert jnp.allclose(mu, mu_ref, atol=1e-5, rtol=1e-5)
    assert jnp.allclose(sigma, sigma_ref, atol=1e-5, rtol=1e-5)
    assert bool(jnp.all(sigma > 0))

    print("KERNEL_OK")
</pallas_src>

<mosaic_0001>
module attributes {stable_mosaic.version = 11 : i64} {
  func.func @_actor_kernel(%arg0: i32, %arg1: memref<8x8xf32, #tpu.memory_space<vmem>>, %arg2: memref<8x128xf32, #tpu.memory_space<vmem>>, %arg3: memref<1x128xf32, #tpu.memory_space<vmem>>, %arg4: memref<128x128xf32, #tpu.memory_space<vmem>>, %arg5: memref<1x128xf32, #tpu.memory_space<vmem>>, %arg6: memref<128x128xf32, #tpu.memory_space<vmem>>, %arg7: memref<1x128xf32, #tpu.memory_space<vmem>>, %arg8: memref<8x128xf32, #tpu.memory_space<vmem>>) attributes {dimension_semantics = [#tpu.dimension_semantics<parallel>], iteration_bounds = array<i64: 1>, scalar_prefetch = 0 : i64, scratch_operands = 0 : i64, tpu.core_type = #tpu.core_type<tc>, window_params = [{transform_indices = @transform_0, window_bounds = array<i64: 8, 8>}, {pipeline_mode = #tpu.pipeline_mode<synchronous>, transform_indices = @transform_1, window_bounds = array<i64: 8, 128>}, {pipeline_mode = #tpu.pipeline_mode<synchronous>, transform_indices = @transform_2, window_bounds = array<i64: 1, 128>}, {pipeline_mode = #tpu.pipeline_mode<synchronous>, transform_indices = @transform_3, window_bounds = array<i64: 128, 128>}, {pipeline_mode = #tpu.pipeline_mode<synchronous>, transform_indices = @transform_4, window_bounds = array<i64: 1, 128>}, {pipeline_mode = #tpu.pipeline_mode<synchronous>, transform_indices = @transform_5, window_bounds = array<i64: 128, 128>}, {pipeline_mode = #tpu.pipeline_mode<synchronous>, transform_indices = @transform_6, window_bounds = array<i64: 1, 128>}, {transform_indices = @transform_7, window_bounds = array<i64: 8, 128>}]} {
    %c0 = arith.constant 0 : index
    %c0_0 = arith.constant 0 : index
    %0 = vector.load %arg1[%c0, %c0_0] : memref<8x8xf32, #tpu.memory_space<vmem>>, vector<8x8xf32>
    %c0_1 = arith.constant 0 : index
    %c0_2 = arith.constant 0 : index
    %1 = vector.load %arg2[%c0_1, %c0_2] : memref<8x128xf32, #tpu.memory_space<vmem>>, vector<8x128xf32>
    %cst = arith.constant dense<0.000000e+00> : vector<8x128xf32>
    %2 = tpu.matmul %0, %1, %cst {dimension_numbers = #tpu.dot_dimension_numbers<[1], [0], [0], [1], [0, 0, 1, 1], [], []>} : vector<8x8xf32>, vector<8x128xf32>, vector<8x128xf32> -> vector<8x128xf32>
    %c0_3 = arith.constant 0 : index
    %c0_4 = arith.constant 0 : index
    %3 = vector.load %arg3[%c0_3, %c0_4] : memref<1x128xf32, #tpu.memory_space<vmem>>, vector<1x128xf32>
    %4 = vector.broadcast %3 : vector<1x128xf32> to vector<8x128xf32>
    %5 = arith.addf %2, %4 : vector<8x128xf32>
    %cst_5 = arith.constant 0.000000e+00 : f32
    %6 = vector.broadcast %cst_5 : f32 to vector<8x128xf32>
    %7 = arith.maximumf %5, %6 : vector<8x128xf32>
    %c0_6 = arith.constant 0 : index
    %c0_7 = arith.constant 0 : index
    %8 = vector.load %arg4[%c0_6, %c0_7] : memref<128x128xf32, #tpu.memory_space<vmem>>, vector<128x128xf32>
    %cst_8 = arith.constant dense<0.000000e+00> : vector<8x128xf32>
    %9 = tpu.matmul %7, %8, %cst_8 {dimension_numbers = #tpu.dot_dimension_numbers<[1], [0], [0], [1], [0, 0, 1, 1], [], []>} : vector<8x128xf32>, vector<128x128xf32>, vector<8x128xf32> -> vector<8x128xf32>
    %c0_9 = arith.constant 0 : index
    %c0_10 = arith.constant 0 : index
    %10 = vector.load %arg5[%c0_9, %c0_10] : memref<1x128xf32, #tpu.memory_space<vmem>>, vector<1x128xf32>
    %11 = vector.broadcast %10 : vector<1x128xf32> to vector<8x128xf32>
    %12 = arith.addf %9, %11 : vector<8x128xf32>
    %cst_11 = arith.constant 0.000000e+00 : f32
    %13 = vector.broadcast %cst_11 : f32 to vector<8x128xf32>
    %14 = arith.maximumf %12, %13 : vector<8x128xf32>
    %c0_12 = arith.constant 0 : index
    %c0_13 = arith.constant 0 : index
    %15 = vector.load %arg6[%c0_12, %c0_13] : memref<128x128xf32, #tpu.memory_space<vmem>>, vector<128x128xf32>
    %cst_14 = arith.constant dense<0.000000e+00> : vector<8x128xf32>
    %16 = tpu.matmul %14, %15, %cst_14 {dimension_numbers = #tpu.dot_dimension_numbers<[1], [0], [0], [1], [0, 0, 1, 1], [], []>} : vector<8x128xf32>, vector<128x128xf32>, vector<8x128xf32> -> vector<8x128xf32>
    %c0_15 = arith.constant 0 : index
    %c0_16 = arith.constant 0 : index
    %17 = vector.load %arg7[%c0_15, %c0_16] : memref<1x128xf32, #tpu.memory_space<vmem>>, vector<1x128xf32>
    %18 = vector.broadcast %17 : vector<1x128xf32> to vector<8x128xf32>
    %19 = arith.addf %16, %18 : vector<8x128xf32>
    %cst_17 = arith.constant 0.000000e+00 : f32
    %20 = vector.broadcast %cst_17 : f32 to vector<8x128xf32>
    %21 = arith.maximumf %19, %20 : vector<8x128xf32>
    %22 = math.absf %19 : vector<8x128xf32>
    %cst_18 = arith.constant 0.000000e+00 : f32
    %23 = vector.broadcast %cst_18 : f32 to vector<8x128xf32>
    %24 = arith.subf %23, %22 : vector<8x128xf32>
    %25 = math.exp %24 : vector<8x128xf32>
    %26 = math.log1p %25 : vector<8x128xf32>
    %27 = arith.addf %21, %26 : vector<8x128xf32>
    %cst_19 = arith.constant 9.99999974E-5 : f32
    %28 = vector.broadcast %cst_19 : f32 to vector<8x128xf32>
    %29 = arith.addf %27, %28 : vector<8x128xf32>
    %30 = tpu.iota {dimensions = array<i32: 1>} : vector<8x128xi32>
    %c4_i32 = arith.constant 4 : i32
    %31 = vector.broadcast %c4_i32 : i32 to vector<8x128xi32>
    %32 = arith.cmpi slt, %30, %31 : vector<8x128xi32>
    %33 = math.tanh %19 : vector<8x128xf32>
    %34 = arith.select %32, %33, %29 : vector<8x128xi1>, vector<8x128xf32>
    %c0_20 = arith.constant 0 : index
    %c0_21 = arith.constant 0 : index
    %35 = vector.load %arg8[%c0_20, %c0_21] : memref<8x128xf32, #tpu.memory_space<vmem>>, vector<8x128xf32>
    tpu.vector_store %arg8[%c0_20, %c0_21], %34 {strides = array<i32>} : memref<8x128xf32, #tpu.memory_space<vmem>>, vector<8x128xf32>,
    return
  }
  func.func @transform_0(%arg0: i32) -> (i32, i32) {
    %c0_i32 = arith.constant 0 : i32
    %c0_i32_0 = arith.constant 0 : i32
    return %arg0, %c0_i32 : i32, i32
  }
  func.func @transform_1(%arg0: i32) -> (i32, i32) {
    %c0_i32 = arith.constant 0 : i32
    %c0_i32_0 = arith.constant 0 : i32
    %c0_i32_1 = arith.constant 0 : i32
    return %c0_i32, %c0_i32_0 : i32, i32
  }
  func.func @transform_2(%arg0: i32) -> (i32, i32) {
    %c0_i32 = arith.constant 0 : i32
    %c0_i32_0 = arith.constant 0 : i32
    %c0_i32_1 = arith.constant 0 : i32
    return %c0_i32, %c0_i32_0 : i32, i32
  }
  func.func @transform_3(%arg0: i32) -> (i32, i32) {
    %c0_i32 = arith.constant 0 : i32
    %c0_i32_0 = arith.constant 0 : i32
    %c0_i32_1 = arith.constant 0 : i32
    return %c0_i32, %c0_i32_0 : i32, i32
  }
  func.func @transform_4(%arg0: i32) -> (i32, i32) {
    %c0_i32 = arith.constant 0 : i32
    %c0_i32_0 = arith.constant 0 : i32
    %c0_i32_1 = arith.constant 0 : i32
    return %c0_i32, %c0_i32_0 : i32, i32
  }
  func.func @transform_5(%arg0: i32) -> (i32, i32) {
    %c0_i32 = arith.constant 0 : i32
    %c0_i32_0 = arith.constant 0 : i32
    %c0_i32_1 = arith.constant 0 : i32
    return %c0_i32, %c0_i32_0 : i32, i32
  }
  func.func @transform_6(%arg0: i32) -> (i32, i32) {
    %c0_i32 = arith.constant 0 : i32
    %c0_i32_0 = arith.constant 0 : i32
    %c0_i32_1 = arith.constant 0 : i32
    return %c0_i32, %c0_i32_0 : i32, i32
  }
  func.func @transform_7(%arg0: i32) -> (i32, i32) {
    %c0_i32 = arith.constant 0 : i32
    %c0_i32_0 = arith.constant 0 : i32
    return %arg0, %c0_i32 : i32, i32
  }
}

</mosaic_0001>

<bundles_post_ra>
// kernel: tpu_custom_call.1
= control target key start
LH: loop header
LB: loop body
LE: loop exit
PB: predicated region body
PF: predicated region fallthrough
CT: control target
= control target key end

     0   :  { %12 = vsyncpa [#allocation3], 0  ;;  %s455_s0 = inlined_call_operand.hbm [shape: f32[8,8], index: 0, kind: input, shape index: {}]   ;;  %s456_s1 = inlined_call_operand.hbm [shape: f32[8,128], index: 1, kind: input, shape index: {}]   ;;  %s457_s2 = inlined_call_operand.vmem [shape: f32[1,128], index: 2, kind: input, shape index: {}]   ;;  %s458_s3 = inlined_call_operand.hbm [shape: f32[128,128], index: 3, kind: input, shape index: {}]   ;;  %s459_s4 = inlined_call_operand.vmem [shape: f32[1,128], index: 4, kind: input, shape index: {}]   ;;  %s460_s5 = inlined_call_operand.hbm [shape: f32[128,128], index: 5, kind: input, shape index: {}]   ;;  %s461_s6 = inlined_call_operand.vmem [shape: f32[1,128], index: 6, kind: input, shape index: {}]   ;;  %s462_s7 = inlined_call_operand.hbm [shape: f32[8,128], index: 7, kind: output, shape index: {}]  }
   0x1   :  { %13 = vsyncpa [#allocation6], 0 }
   0x2   :  { %14 = vsyncpa [#allocation9], 0  ;;  %s32_s26 = sshll.u32 %s456_s1, 4  ;;  %s33_s26 = int_to_ptr.hbm [resolvable:$true] %s32_s26 }
   0x3   :  { %15 = vsyncpa [#allocation4], 0  ;;  %s384_s27 = smov [#allocation5]   ;;  %s21_s8 = sshll.u32 %s455_s0, 4  ;;  %s22_s8 = int_to_ptr.hbm [resolvable:$true] %s21_s8 }
   0x4   :  { %s34_s28 = sshll.u32 %s384_s27, 4  ;;  %s385_s9 = smov [#allocation2]   ;;  %s35_s28 = int_to_ptr.vmem [resolvable:$true] %s34_s28 }
   0x5   :  { %37 = dma.hbm_to_vmem [thread:$0]  %s33_s26, 128, %s35_s28, [#allocation6]  }
   0x6   :  { %s23_s10 = sshll.u32 %s385_s9, 4  ;;  %s44_s13 = sshll.u32 %s458_s3, 4  ;;  %s24_s10 = int_to_ptr.vmem [resolvable:$true] %s23_s10  ;;  %s45_s13 = int_to_ptr.hbm [resolvable:$true] %s44_s13 }
   0x7   :  { %26 = dma.hbm_to_vmem [thread:$0]  %s22_s8, 128, %s24_s10, [#allocation3]  }
   0x8   :  { %s386_s1 = smov [#allocation7]   ;;  %s59_s17 = sshll.u32 %s460_s5, 4  ;;  %s60_s17 = int_to_ptr.hbm [resolvable:$true] %s59_s17 }
   0x9   :  { %s46_s14 = sshll.u32 %s386_s1, 4  ;;  %s387_s18 = smov 128   ;;  %s47_s14 = int_to_ptr.vmem [resolvable:$true] %s46_s14 }
   0xa   :  { %s388_s0 = smov 8   ;;  %s389_s19 = smov [#allocation8]  }
   0xb   :  { %52 = dma.hbm_to_vmem [thread:$0]  %s45_s13, 2048, %s47_s14, [#allocation6], %s387_s18, %s387_s18, %s388_s0  }
   0xc   :  { %s61_s20 = sshll.u32 %s389_s19, 4  ;;  %s62_s20 = int_to_ptr.vmem [resolvable:$true] %s61_s20 }
   0xd   :  { %67 = dma.hbm_to_vmem [thread:$0]  %s60_s17, 2048, %s62_s20, [#allocation9], %s387_s18, %s387_s18, %s388_s0  }
   0xe   :  { %376 = dma.done.wait [#allocation3], 128  }
   0xf   :  { %377 = vsyncadd [#allocation3], 4294967168 }
  0x10   :  { %378 = dma.done.wait [#allocation6], 2176  }
  0x11   :  { %379 = vsyncadd [#allocation6], 4294965120 }
  0x12   :  { %380 = dma.done.wait [#allocation9], 2048  }
  0x13   :  { %381 = vsyncadd [#allocation9], 4294965248  ;;  %vm92_vm0 = vcmask 64512   ;;  %v87_v0 = vld [vmem:[#allocation5] sm:$0xff]  ;;  %v86_v1 = vld [vmem:[#allocation2] sm:$0xff]  ;;  %v214_v52 = vlaneseq  ;;  %s227_s26 = sshll.u32 %s462_s7, 4  ;;  %s228_s26 = int_to_ptr.hbm [resolvable:$true] %s227_s26 }
  0x14   :  { %v132_v2 = vld [vmem:[#allocation7 + $0x78] sm:$0xff]  ;;  %111 = vmatpush.msra.mxu0 %v87_v0  ;;  %v131_v3 = vld [vmem:[#allocation7 + $0x70] sm:$0xff]  ;;  %v130_v4 = vld [vmem:[#allocation7 + $0x68] sm:$0xff] }
  0x15   :  { %137 = vmatpush.msra.mxu1 %v132_v2  ;;  %239 = vmatmul.msk.f32.vlgmr.msra.gmra.mxu0 %vm92_vm0, %v86_v1  ;;  %v129_v5 = vld [vmem:[#allocation7 + $0x60] sm:$0xff]  ;;  %v128_v6 = vld [vmem:[#allocation7 + $0x58] sm:$0xff]  ;;  %v127_v7 = vld [vmem:[#allocation7 + $0x50] sm:$0xff]  ;;  %v215_v57 = vand.u32 127, %v214_v52 }
  0x16   :  { %v126_v8 = vld [vmem:[#allocation7 + $0x48] sm:$0xff]  ;;  %v125_v9 = vld [vmem:[#allocation7 + $0x40] sm:$0xff]  ;;  %v124_v10 = vld [vmem:[#allocation7 + $0x38] sm:$0xff] }
  0x17   :  { %138 = vmatpush.msra.mxu1 %v131_v3  ;;  %v123_v11 = vld [vmem:[#allocation7 + $0x30] sm:$0xff]  ;;  %v122_v12 = vld [vmem:[#allocation7 + $0x28] sm:$0xff]  ;;  %v121_v13 = vld [vmem:[#allocation7 + $0x20] sm:$0xff]  ;;  %vm216_vm2 = vcmp.lt.s32.totalorder %v215_v57, 4 }
  0x18   :  { %v120_v14 = vld [vmem:[#allocation7 + $0x18] sm:$0xff]  ;;  %v119_v15 = vld [vmem:[#allocation7 + $0x10] sm:$0xff]  ;;  %v118_v16 = vld [vmem:[#allocation7 + $0x8] sm:$0xff] }
  0x19   :  { %139 = vmatpush.msra.mxu1 %v130_v4  ;;  %v117_v17 = vld [vmem:[#allocation7] sm:$0xff]  ;;  %v173_v18 = vld [vmem:[#allocation8 + $0x78] sm:$0xff]  ;;  %v172_v19 = vld [vmem:[#allocation8 + $0x70] sm:$0xff] }
  0x1a   :  { %178 = vmatpush.msra.mxu2 %v173_v18  ;;  %v171_v20 = vld [vmem:[#allocation8 + $0x68] sm:$0xff]  ;;  %v170_v21 = vld [vmem:[#allocation8 + $0x60] sm:$0xff]  ;;  %v169_v22 = vld [vmem:[#allocation8 + $0x58] sm:$0xff] }
  0x1b   :  { %140 = vmatpush.msra.mxu1 %v129_v5  ;;  %v168_v23 = vld [vmem:[#allocation8 + $0x50] sm:$0xff]  ;;  %v167_v24 = vld [vmem:[#allocation8 + $0x48] sm:$0xff]  ;;  %v166_v25 = vld [vmem:[#allocation8 + $0x40] sm:$0xff] }
  0x1c   :  { %179 = vmatpush.msra.mxu2 %v172_v19  ;;  %v165_v26 = vld [vmem:[#allocation8 + $0x38] sm:$0xff]  ;;  %v164_v27 = vld [vmem:[#allocation8 + $0x30] sm:$0xff]  ;;  %v163_v28 = vld [vmem:[#allocation8 + $0x28] sm:$0xff] }
  0x1d   :  { %141 = vmatpush.msra.mxu1 %v128_v6  ;;  %v162_v29 = vld [vmem:[#allocation8 + $0x20] sm:$0xff]  ;;  %v161_v30 = vld [vmem:[#allocation8 + $0x18] sm:$0xff]  ;;  %v247_v31 = vld [vmem:[%s457_s2] ss:$0 sm:$0xff] }
  0x1e   :  { %180 = vmatpush.msra.mxu2 %v171_v20  ;;  %v160_v35 = vld [vmem:[#allocation8 + $0x10] sm:$0xff]  ;;  %v159_v36 = vld [vmem:[#allocation8 + $0x8] sm:$0xff]  ;;  %v158_v37 = vld [vmem:[#allocation8] sm:$0xff] }
  0x1f   :  { %142 = vmatpush.msra.mxu1 %v127_v7  ;;  %v248_v38 = vld [vmem:[%s459_s4] ss:$0 sm:$0xff]  ;;  %s390_s4 = smov [#allocation10]  }
  0x20   :  { %181 = vmatpush.msra.mxu2 %v170_v21  ;;  %v249_v42 = vld [vmem:[%s461_s6] ss:$0 sm:$0xff]  ;;  %s225_s6 = sshll.u32 %s390_s4, 4  ;;  %s226_s6 = int_to_ptr.vmem [resolvable:$true] %s225_s6 }
  0x21   :  { %143 = vmatpush.msra.mxu1 %v126_v8 }
  0x22   :  { %182 = vmatpush.msra.mxu2 %v169_v22 }
  0x23   :  { %144 = vmatpush.msra.mxu1 %v125_v9 }
  0x24   :  { %183 = vmatpush.msra.mxu2 %v168_v23 }
  0x25   :  { %145 = vmatpush.msra.mxu1 %v124_v10 }
  0x26   :  { %184 = vmatpush.msra.mxu2 %v167_v24 }
  0x27   :  { %146 = vmatpush.msra.mxu1 %v123_v11 }
  0x28   :  { %185 = vmatpush.msra.mxu2 %v166_v25 }
  0x29   :  { %147 = vmatpush.msra.mxu1 %v122_v12 }
  0x2a   :  { %186 = vmatpush.msra.mxu2 %v165_v26 }
  0x2b   :  { %148 = vmatpush.msra.mxu1 %v121_v13 }
  0x2c   :  { %187 = vmatpush.msra.mxu2 %v164_v27 }
  0x2d   :  { %149 = vmatpush.msra.mxu1 %v120_v14 }
  0x2e   :  { %188 = vmatpush.msra.mxu2 %v163_v28 }
  0x2f   :  { %150 = vmatpush.msra.mxu1 %v119_v15 }
  0x30   :  { %189 = vmatpush.msra.mxu2 %v162_v29 }
  0x31   :  { %151 = vmatpush.msra.mxu1 %v118_v16 }
  0x32   :  { %190 = vmatpush.msra.mxu2 %v161_v30 }
  0x33   :  { %152 = vmatpush.msra.mxu1 %v117_v17 }
  0x34   :  { %191 = vmatpush.msra.mxu2 %v160_v35 }
  0x36   :  { %192 = vmatpush.msra.mxu2 %v159_v36 }
  0x38   :  { %193 = vmatpush.msra.mxu2 %v158_v37 }
  0x92   :  { %v113_v32 = vpop.f32.mrf.mxu0 }
  0x93   :  { %v114_v33 = vadd.f32 %v247_v31, %v113_v32 }
  0x95   :  { %v116_v34 = vmax.f32 %v114_v33, 0.0 }
  0x97   :  { %153 = vmatmul.f32.vlgmr.msra.gmra.mxu1 %v116_v34 }
 0x114   :  { %v154_v39 = vpop.f32.mrf.mxu1 }
 0x115   :  { %v155_v40 = vadd.f32 %v248_v38, %v154_v39 }
 0x117   :  { %v157_v41 = vmax.f32 %v155_v40, 0.0 }
 0x119   :  { %194 = vmatmul.f32.vlgmr.msra.gmra.mxu2 %v157_v41 }
 0x19c   :  { %v195_v43 = vpop.f32.mrf.mxu2 }
 0x19d   :  { %v196_v44 = vadd.f32 %v249_v42, %v195_v43 }
 0x19f   :  { %v199_v45 = vand.u32 2147483647, %v196_v44  ;;  %v198_v58 = vmax.f32 %v196_v44, 0.0 }
 0x1a1   :  { %v200_v46 = vsub.f32 0.0, %v199_v45 }
 0x1a3   :  { %v201_v47 = vmul.f32 1.442695, %v200_v46 }
 0x1a5   :  { %250 = vpow2.f32 %v201_v47 }
 0x1ab   :  { %v251_v48 = vpop.eup %250 }
 0x1ac   :  { %v203_v49 = vadd.f32 1.0, %v251_v48  ;;  %v206_v50 = vmul.f32 -0.5, %v251_v48  ;;  %v209_v53 = vand.u32 2147483647, %v251_v48 }
 0x1ae   :  { %252 = vlog2.f32 %v203_v49  ;;  %v207_v51 = vadd.f32 1.0, %v206_v50  ;;  %vm210_vm1 = vcmp.lt.f32.partialorder %v209_v53, 0.0004427343 }
 0x1af   :  { %254 = vtanh.f32 %v196_v44 }
 0x1b0   :  { %v208_v56 = vmul.f32 %v251_v48, %v207_v51 }
 0x1b4   :  { %v253_v54 = vpop.eup %252 }
 0x1b5   :  { %v205_v55 = vmul.f32 0.6931472, %v253_v54  ;;  %v255_v62 = vpop.eup %254 }
 0x1b7   :  { %v211_v59 = vsel %vm210_vm1, %v208_v56, %v205_v55 }
 0x1b8   :  { %v212_v60 = vadd.f32 %v211_v59, %v198_v58 }
 0x1ba   :  { %v213_v61 = vadd.f32 0.0001, %v212_v60 }
 0x1bc   :  { %v218_v63 = vsel %vm216_vm2, %v255_v62, %v213_v61 }
 0x1bd   :  { %219 = vst [vmem:[#allocation10] sm:$0xff] %v218_v63 }
 0x1be   :  { %230 = dma.vmem_to_hbm [thread:$0]  %s226_s6, 128, %s228_s26, [#allocation4]  }
 0x1bf   :  { %382 = dma.done.wait [#allocation4], 128  }
 0x1c0   :  { %383 = vsyncadd [#allocation4], 4294967168 }
 0x1c1   :  { %235 = vsyncpa [#allocation3], 1 }
 0x1c2   :  { %236 = vsyncpa [#allocation6], 1 }
 0x1c3   :  { %237 = vsyncpa [#allocation9], 1 }
 0x1c4   :  { %238 = vsyncpa [#allocation4], 1 }

</bundles_post_ra>
